<compile_context>
chip_gen: v7x
topology: tpu7x:2x2x1
jax: 0.10.0
libtpu: 0.0.40
codegen_flags: <defaults>
</compile_context>

<pallas_src>
import functools

import jax
import jax.numpy as jnp
from jax import lax
from jax.experimental import pallas as pl
from jax.experimental.pallas import tpu as pltpu


def _round_up(x, m):
    return (x + m - 1) // m * m


def _dwpw_stats_kernel(x_ref, w_ref, beff_ref, mask_ref, y_ref, stats_ref,
                       m_ref, *, offsets):
    """Fused depthwise(3x3x3, stride 2) + pointwise(1x1x1) conv for a block of
    samples, plus partial BatchNorm statistics.

    x_ref    : (8*C, Lb)         phase-split, flattened, lane-dense input slab
    w_ref    : (8*Cout, 8*C)     folded (pointwise x depthwise) weights, one
                                 (Cout, 8*C) row-group per stride-2 offset group
    beff_ref : (Cout, 1)         folded depthwise bias
    mask_ref : (1, Lb)           1.0 at valid output positions, 0.0 elsewhere
    y_ref    : (Cout, Lb)        pre-BN output (garbage at invalid positions)
    stats_ref: (1, Cout, 2)      per-block [sum, sum_of_squares] over valid pos.
    m_ref    : (8*Cout, Lb+tail) VMEM scratch for the matmul result (+ zero tail
                                 so every shifted window read stays in bounds)
    """
    Cout = y_ref.shape[0]
    Lb = y_ref.shape[1]
    tail = m_ref.shape[1] - Lb

    # Zero tail: shifted reads for *invalid* output positions land here, so they
    # stay finite (valid positions never read past their own sample segment).
    m_ref[:, Lb:] = jnp.zeros((m_ref.shape[0], tail), jnp.float32)

    # One MXU matmul covers all 27 depthwise taps x pointwise conv.
    m_ref[:, :Lb] = jnp.dot(w_ref[...], x_ref[...],
                            preferred_element_type=jnp.float32)

    # The +/-1 tap shifts of the stride-2 offset groups are static lane-offset
    # reads of the matmul result (no roll / relayout of the big input slab).
    y = beff_ref[...]                                  # (Cout, 1) broadcast
    for g, off in enumerate(offsets):
        y = y + m_ref[g * Cout:(g + 1) * Cout, off:off + Lb]
    y_ref[...] = y

    # Partial BatchNorm statistics over valid positions only (one-pass sums).
    ym = y * mask_ref[...]
    ssum = jnp.sum(ym, axis=1, keepdims=True)          # (Cout, 1)
    ssq = jnp.sum(ym * y, axis=1, keepdims=True)       # (Cout, 1)
    stats_ref[0] = jnp.concatenate([ssum, ssq], axis=1)


def _bn_relu_kernel(y_ref, scale_ref, shift_ref, o_ref):
    """Apply the global BatchNorm affine + ReLU on a lane-dense (Cout, L) slab."""
    o_ref[...] = jnp.maximum(y_ref[...] * scale_ref[...] + shift_ref[...], 0.0)


@functools.partial(jax.jit, static_argnames=("stride", "padding", "eps"))
def depth_conv_layer(x_ncdhw, w_dw, b_dw, w_pw, gamma, beta, *, stride=2,
                     padding=1, eps=1e-5):
    """DepthConvLayer forward.

    x_ncdhw : (N, C, D, H, W) float32, PyTorch NCDHW convention
    w_dw    : (27, C)   depthwise taps, row index = kd*9 + kh*3 + kw
    b_dw    : (C,)      depthwise bias
    w_pw    : (C, Cout) pointwise 1x1x1 weight (no bias)
    gamma   : (Cout,), beta: (Cout,)   BatchNorm affine parameters
    returns : (N, Cout, Do, Ho, Wo)    NCDHW
    """
    if stride != 2 or padding != 1:
        raise NotImplementedError("phase decomposition assumes k=3, stride=2, padding=1")
    K = 3
    N, C, D, H, W = x_ncdhw.shape
    Cout = w_pw.shape[1]
    Do = (D + 2 * padding - K) // stride + 1
    Ho = (H + 2 * padding - K) // stride + 1
    Wo = (W + 2 * padding - K) // stride + 1
    D1, H1, W1 = Do + 1, Ho + 1, Wo + 1
    S = Do * Ho * Wo
    P = D1 * H1 * W1                     # per-sample flattened phase-slab length
    Pp = _round_up(P, 128)               # lane-padded per-sample length

    # -------- prepass: pad, stride-2 phase split, flatten to a lane-dense slab --------
    # (one XLA pass over x; keeps everything downstream lane-dense / NCDHW-free)
    xp = jnp.pad(x_ncdhw, ((0, 0), (0, 0),
                           (padding, 2 * D1 - D - padding),
                           (padding, 2 * H1 - H - padding),
                           (padding, 2 * W1 - W - padding)))
    xr = xp.reshape(N, C, D1, 2, H1, 2, W1, 2)
    xph = jnp.transpose(xr, (3, 5, 7, 1, 0, 2, 4, 6))   # (2,2,2, C, N, D1, H1, W1)
    x_flat = xph.reshape(8 * C, N, P)
    x_flat = jnp.pad(x_flat, ((0, 0), (0, 0), (0, Pp - P))).reshape(8 * C, N * Pp)

    # -------- fold depthwise taps + pointwise conv into 8 offset-group weights --------
    w_pw_t = jnp.transpose(w_pw)                        # (Cout, C)
    groups = []
    offsets = []
    for od0 in (0, 1):
        for oh0 in (0, 1):
            for ow0 in (0, 1):
                wg = jnp.zeros((Cout, 8, C), jnp.float32)
                for pd in (0, 1):
                    kd = 2 * od0 + pd
                    if kd > 2:
                        continue
                    for ph in (0, 1):
                        kh = 2 * oh0 + ph
                        if kh > 2:
                            continue
                        for pw in (0, 1):
                            kw = 2 * ow0 + pw
                            if kw > 2:
                                continue
                            pidx = pd * 4 + ph * 2 + pw
                            t = kd * 9 + kh * 3 + kw
                            wg = wg.at[:, pidx, :].set(w_pw_t * w_dw[t][None, :])
                groups.append(wg.reshape(Cout, 8 * C))
                offsets.append(od0 * H1 * W1 + oh0 * W1 + ow0)
    w_stack = jnp.concatenate(groups, axis=0)           # (8*Cout, 8*C)
    offsets = tuple(offsets)
    b_eff = w_pw_t @ b_dw.reshape(C, 1)                 # (Cout, 1) folded dw bias

    # valid-position mask over the padded per-sample axis (same for every sample)
    pos = jnp.arange(Pp, dtype=jnp.int32)
    od_ = pos // (H1 * W1)
    oh_ = (pos % (H1 * W1)) // W1
    ow_ = pos % W1
    valid = ((od_ < Do) & (oh_ < Ho) & (ow_ < Wo)).astype(jnp.float32)
    mask = jnp.tile(valid, N).reshape(1, N * Pp)

    # -------- blocking: Nb samples per grid step (Nb divides N, small VMEM blocks) --------
    Nb = max(1, min(N, 2048 // Pp))
    while N % Nb:
        Nb -= 1
    nblocks = N // Nb
    Lb = Nb * Pp
    tail = _round_up(H1 * W1 + W1 + 2, 128)             # >= max offset, 128-aligned

    # ---------------- pass 1: folded depthwise+pointwise conv + partial BN stats ----------------
    y_pre, stats = pl.pallas_call(
        functools.partial(_dwpw_stats_kernel, offsets=offsets),
        out_shape=(jax.ShapeDtypeStruct((Cout, N * Pp), jnp.float32),
                   jax.ShapeDtypeStruct((nblocks, Cout, 2), jnp.float32)),
        grid_spec=pltpu.PrefetchScalarGridSpec(
            num_scalar_prefetch=0,
            grid=(nblocks,),
            in_specs=[
                pl.BlockSpec((8 * C, Lb), lambda i: (0, i)),        # input slab
                pl.BlockSpec((8 * Cout, 8 * C), lambda i: (0, 0)),  # folded weights
                pl.BlockSpec((Cout, 1), lambda i: (0, 0)),          # folded bias
                pl.BlockSpec((1, Lb), lambda i: (0, i)),            # valid mask
            ],
            out_specs=[
                pl.BlockSpec((Cout, Lb), lambda i: (0, i)),
                pl.BlockSpec((1, Cout, 2), lambda i: (i, 0, 0)),
            ],
            scratch_shapes=[pltpu.VMEM((8 * Cout, Lb + tail), jnp.float32)],
        ),
        compiler_params=pltpu.CompilerParams(
            dimension_semantics=("parallel",)),
    )(x_flat, w_stack, b_eff, mask)

    # ---------------- global BatchNorm stats (training mode, biased variance) ----------------
    # NOTE: one-pass E[y^2]-E[y]^2 in f32; good enough here, clamped at 0.
    tot = jnp.sum(stats, axis=0)                        # (Cout, 2)
    cnt = jnp.float32(N * S)
    mean = tot[:, 0] / cnt
    var = jnp.maximum(tot[:, 1] / cnt - mean * mean, 0.0)
    inv = lax.rsqrt(var + eps)
    scale = (gamma * inv).reshape(Cout, 1)
    shift = (beta - mean * gamma * inv).reshape(Cout, 1)

    # ---------------- pass 2: y*scale + shift, ReLU (lane-dense, in place over y) ----------------
    out_flat = pl.pallas_call(
        _bn_relu_kernel,
        out_shape=jax.ShapeDtypeStruct((Cout, N * Pp), jnp.float32),
        grid_spec=pltpu.PrefetchScalarGridSpec(
            num_scalar_prefetch=0,
            grid=(nblocks,),
            in_specs=[pl.BlockSpec((Cout, Lb), lambda i: (0, i)),
                      pl.BlockSpec((Cout, 1), lambda i: (0, 0)),
                      pl.BlockSpec((Cout, 1), lambda i: (0, 0))],
            out_specs=pl.BlockSpec((Cout, Lb), lambda i: (0, i)),
        ),
        input_output_aliases={0: 0},
        compiler_params=pltpu.CompilerParams(
            dimension_semantics=("parallel",)),
    )(y_pre, scale, shift)

    # -------- epilogue: drop padding / invalid positions, restore NCDHW (small output) --------
    out = out_flat.reshape(Cout, N, Pp)[:, :, :P]
    out = out.reshape(Cout, N, D1, H1, W1)[:, :, :Do, :Ho, :Wo]
    out = jnp.transpose(out, (1, 0, 2, 3, 4))           # (N, Cout, Do, Ho, Wo)
    # Dropout3d(0.0) and pool=None are identities.
    # TODO(synk): BatchNorm3d running_mean/running_var momentum updates (module
    # state) are not produced; only the forward output is computed.
    return out


def init_params(key, in_ch, out_ch, kernel_size=3):
    """Deterministic synthetic parameters (shapes match the nn.Module)."""
    k1, k2, k3 = jax.random.split(key, 3)
    taps = kernel_size ** 3
    # depthwise Conv3d weight: torch (in_ch, 1, 3, 3, 3) -> stored (27, in_ch)
    w_dw = 0.1 * jax.random.normal(k1, (taps, in_ch), jnp.float32)
    b_dw = 0.1 * jax.random.normal(k2, (in_ch,), jnp.float32)
    # pointwise Conv3d weight: torch (out_ch, in_ch, 1, 1, 1) -> stored (in_ch, out_ch)
    w_pw = 0.1 * jax.random.normal(k3, (in_ch, out_ch), jnp.float32)
    # BatchNorm3d affine defaults
    gamma = jnp.ones((out_ch,), jnp.float32)
    beta = jnp.zeros((out_ch,), jnp.float32)
    return w_dw, b_dw, w_pw, gamma, beta


if __name__ == "__main__":
    key = jax.random.PRNGKey(0)
    kx, kp = jax.random.split(key)

    N, in_ch, out_ch = 2, 4, 8
    D = H = W = 8
    x = jax.random.normal(kx, (N, in_ch, D, H, W), jnp.float32)   # NCDHW input

    w_dw, b_dw, w_pw, gamma, beta = init_params(kp, in_ch, out_ch)

    out = depth_conv_layer(x, w_dw, b_dw, w_pw, gamma, beta, stride=2, padding=1)
    out = jax.block_until_ready(out)

    assert out.shape == (N, out_ch, 4, 4, 4), out.shape
    assert bool(jnp.all(jnp.isfinite(out)))
    assert bool(jnp.all(out >= 0.0))   # ReLU output

    print("KERNEL_OK")
</pallas_src>

<mosaic_0001>
module attributes {stable_mosaic.version = 11 : i64} {
  func.func @_dwpw_stats_kernel(%arg0: i32, %arg1: memref<32x256xf32, #tpu.memory_space<vmem>>, %arg2: memref<64x32xf32, #tpu.memory_space<vmem>>, %arg3: memref<8x1xf32, #tpu.memory_space<vmem>>, %arg4: memref<1x256xf32, #tpu.memory_space<vmem>>, %arg5: memref<8x256xf32, #tpu.memory_space<vmem>>, %arg6: memref<1x8x2xf32, #tpu.memory_space<vmem>>, %arg7: memref<64x384xf32, #tpu.memory_space<vmem>>) attributes {dimension_semantics = [#tpu.dimension_semantics<parallel>], iteration_bounds = array<i64: 1>, scalar_prefetch = 0 : i64, scratch_operands = 1 : i64, tpu.core_type = #tpu.core_type<tc>, window_params = [{transform_indices = @transform_0, window_bounds = array<i64: 32, 256>}, {pipeline_mode = #tpu.pipeline_mode<synchronous>, transform_indices = @transform_1, window_bounds = array<i64: 64, 32>}, {pipeline_mode = #tpu.pipeline_mode<synchronous>, transform_indices = @transform_2, window_bounds = array<i64: 8, 1>}, {transform_indices = @transform_3, window_bounds = array<i64: 1, 256>}, {transform_indices = @transform_4, window_bounds = array<i64: 8, 256>}, {transform_indices = @transform_5, window_bounds = array<i64: 1, 8, 2>}]} {
    %cst = arith.constant 0.000000e+00 : f32
    %0 = vector.broadcast %cst : f32 to vector<64x128xf32>
    %c0 = arith.constant 0 : index
    %c256 = arith.constant 256 : index
    %1 = vector.load %arg7[%c0, %c256] : memref<64x384xf32, #tpu.memory_space<vmem>>, vector<64x128xf32>
    tpu.vector_store %arg7[%c0, %c256], %0 {strides = array<i32>} : memref<64x384xf32, #tpu.memory_space<vmem>>, vector<64x128xf32>,
    %c0_0 = arith.constant 0 : index
    %c0_1 = arith.constant 0 : index
    %2 = vector.load %arg2[%c0_0, %c0_1] : memref<64x32xf32, #tpu.memory_space<vmem>>, vector<64x32xf32>
    %c0_2 = arith.constant 0 : index
    %c0_3 = arith.constant 0 : index
    %3 = vector.load %arg1[%c0_2, %c0_3] : memref<32x256xf32, #tpu.memory_space<vmem>>, vector<32x256xf32>
    %cst_4 = arith.constant dense<0.000000e+00> : vector<64x256xf32>
    %4 = tpu.matmul %2, %3, %cst_4 {dimension_numbers = #tpu.dot_dimension_numbers<[1], [0], [0], [1], [0, 0, 1, 1], [], []>} : vector<64x32xf32>, vector<32x256xf32>, vector<64x256xf32> -> vector<64x256xf32>
    %c0_5 = arith.constant 0 : index
    %c0_6 = arith.constant 0 : index
    %5 = vector.load %arg7[%c0_5, %c0_6] : memref<64x384xf32, #tpu.memory_space<vmem>>, vector<64x256xf32>
    tpu.vector_store %arg7[%c0_5, %c0_6], %4 {strides = array<i32>} : memref<64x384xf32, #tpu.memory_space<vmem>>, vector<64x256xf32>,
    %c0_7 = arith.constant 0 : index
    %c0_8 = arith.constant 0 : index
    %6 = vector.load %arg3[%c0_7, %c0_8] : memref<8x1xf32, #tpu.memory_space<vmem>>, vector<8x1xf32>
    %c0_9 = arith.constant 0 : index
    %c0_10 = arith.constant 0 : index
    %7 = vector.load %arg7[%c0_9, %c0_10] : memref<64x384xf32, #tpu.memory_space<vmem>>, vector<8x256xf32>
    %8 = vector.broadcast %6 : vector<8x1xf32> to vector<8x256xf32>
    %9 = arith.addf %8, %7 : vector<8x256xf32>
    %c8 = arith.constant 8 : index
    %c1 = arith.constant 1 : index
    %10 = vector.load %arg7[%c8, %c1] : memref<64x384xf32, #tpu.memory_space<vmem>>, vector<8x256xf32>
    %11 = arith.addf %9, %10 : vector<8x256xf32>
    %c16 = arith.constant 16 : index
    %c5 = arith.constant 5 : index
    %12 = vector.load %arg7[%c16, %c5] : memref<64x384xf32, #tpu.memory_space<vmem>>, vector<8x256xf32>
    %13 = arith.addf %11, %12 : vector<8x256xf32>
    %c24 = arith.constant 24 : index
    %c6 = arith.constant 6 : index
    %14 = vector.load %arg7[%c24, %c6] : memref<64x384xf32, #tpu.memory_space<vmem>>, vector<8x256xf32>
    %15 = arith.addf %13, %14 : vector<8x256xf32>
    %c32 = arith.constant 32 : index
    %c25 = arith.constant 25 : index
    %16 = vector.load %arg7[%c32, %c25] : memref<64x384xf32, #tpu.memory_space<vmem>>, vector<8x256xf32>
    %17 = arith.addf %15, %16 : vector<8x256xf32>
    %c40 = arith.constant 40 : index
    %c26 = arith.constant 26 : index
    %18 = vector.load %arg7[%c40, %c26] : memref<64x384xf32, #tpu.memory_space<vmem>>, vector<8x256xf32>
    %19 = arith.addf %17, %18 : vector<8x256xf32>
    %c48 = arith.constant 48 : index
    %c30 = arith.constant 30 : index
    %20 = vector.load %arg7[%c48, %c30] : memref<64x384xf32, #tpu.memory_space<vmem>>, vector<8x256xf32>
    %21 = arith.addf %19, %20 : vector<8x256xf32>
    %c56 = arith.constant 56 : index
    %c31 = arith.constant 31 : index
    %22 = vector.load %arg7[%c56, %c31] : memref<64x384xf32, #tpu.memory_space<vmem>>, vector<8x256xf32>
    %23 = arith.addf %21, %22 : vector<8x256xf32>
    %c0_11 = arith.constant 0 : index
    %c0_12 = arith.constant 0 : index
    %24 = vector.load %arg5[%c0_11, %c0_12] : memref<8x256xf32, #tpu.memory_space<vmem>>, vector<8x256xf32>
    tpu.vector_store %arg5[%c0_11, %c0_12], %23 {strides = array<i32>} : memref<8x256xf32, #tpu.memory_space<vmem>>, vector<8x256xf32>,
    %c0_13 = arith.constant 0 : index
    %c0_14 = arith.constant 0 : index
    %25 = vector.load %arg4[%c0_13, %c0_14] : memref<1x256xf32, #tpu.memory_space<vmem>>, vector<1x256xf32>
    %26 = vector.broadcast %25 : vector<1x256xf32> to vector<8x256xf32>
    %27 = arith.mulf %23, %26 : vector<8x256xf32>
    %cst_15 = arith.constant dense<0.000000e+00> : vector<8xf32>
    %28 = vector.multi_reduction <add>, %27, %cst_15 [1] : vector<8x256xf32> to vector<8xf32>
    %29 = vector.shape_cast %28 : vector<8xf32> to vector<8x1xf32>
    %30 = arith.mulf %27, %23 : vector<8x256xf32>
    %cst_16 = arith.constant dense<0.000000e+00> : vector<8xf32>
    %31 = vector.multi_reduction <add>, %30, %cst_16 [1] : vector<8x256xf32> to vector<8xf32>
    %32 = vector.shape_cast %31 : vector<8xf32> to vector<8x1xf32>
    %33 = tpu.concatenate %29, %32 in 1 : vector<8x1xf32>, vector<8x1xf32> -> vector<8x2xf32>
    %c0_17 = arith.constant 0 : index
    %c0_18 = arith.constant 0 : index
    %c0_19 = arith.constant 0 : index
    %34 = vector.load %arg6[%c0_17, %c0_18, %c0_19] : memref<1x8x2xf32, #tpu.memory_space<vmem>>, vector<1x8x2xf32>
    %35 = vector.shape_cast %34 : vector<1x8x2xf32> to vector<8x2xf32>
    %36 = vector.shape_cast %33 : vector<8x2xf32> to vector<1x8x2xf32>
    tpu.vector_store %arg6[%c0_17, %c0_18, %c0_19], %36 {strides = array<i32>} : memref<1x8x2xf32, #tpu.memory_space<vmem>>, vector<1x8x2xf32>,
    return
  }
  func.func @transform_0(%arg0: i32) -> (i32, i32) {
    %c0_i32 = arith.constant 0 : i32
    %c0_i32_0 = arith.constant 0 : i32
    return %c0_i32, %arg0 : i32, i32
  }
  func.func @transform_1(%arg0: i32) -> (i32, i32) {
    %c0_i32 = arith.constant 0 : i32
    %c0_i32_0 = arith.constant 0 : i32
    %c0_i32_1 = arith.constant 0 : i32
    return %c0_i32, %c0_i32_0 : i32, i32
  }
  func.func @transform_2(%arg0: i32) -> (i32, i32) {
    %c0_i32 = arith.constant 0 : i32
    %c0_i32_0 = arith.constant 0 : i32
    %c0_i32_1 = arith.constant 0 : i32
    return %c0_i32, %c0_i32_0 : i32, i32
  }
  func.func @transform_3(%arg0: i32) -> (i32, i32) {
    %c0_i32 = arith.constant 0 : i32
    %c0_i32_0 = arith.constant 0 : i32
    return %c0_i32, %arg0 : i32, i32
  }
  func.func @transform_4(%arg0: i32) -> (i32, i32) {
    %c0_i32 = arith.constant 0 : i32
    %c0_i32_0 = arith.constant 0 : i32
    return %c0_i32, %arg0 : i32, i32
  }
  func.func @transform_5(%arg0: i32) -> (i32, i32, i32) {
    %c0_i32 = arith.constant 0 : i32
    %c0_i32_0 = arith.constant 0 : i32
    %c0_i32_1 = arith.constant 0 : i32
    return %arg0, %c0_i32, %c0_i32_0 : i32, i32, i32
  }
}

module attributes {stable_mosaic.version = 11 : i64} {
  func.func @_bn_relu_kernel(%arg0: i32, %arg1: memref<8x256xf32, #tpu.memory_space<vmem>>, %arg2: memref<8x1xf32, #tpu.memory_space<vmem>>, %arg3: memref<8x1xf32, #tpu.memory_space<vmem>>, %arg4: memref<8x256xf32, #tpu.memory_space<vmem>>) attributes {dimension_semantics = [#tpu.dimension_semantics<parallel>], iteration_bounds = array<i64: 1>, scalar_prefetch = 0 : i64, scratch_operands = 0 : i64, tpu.core_type = #tpu.core_type<tc>, window_params = [{transform_indices = @transform_0, window_bounds = array<i64: 8, 256>}, {pipeline_mode = #tpu.pipeline_mode<synchronous>, transform_indices = @transform_1, window_bounds = array<i64: 8, 1>}, {pipeline_mode = #tpu.pipeline_mode<synchronous>, transform_indices = @transform_2, window_bounds = array<i64: 8, 1>}, {transform_indices = @transform_3, window_bounds = array<i64: 8, 256>}]} {
    %c0 = arith.constant 0 : index
    %c0_0 = arith.constant 0 : index
    %0 = vector.load %arg1[%c0, %c0_0] : memref<8x256xf32, #tpu.memory_space<vmem>>, vector<8x256xf32>
    %c0_1 = arith.constant 0 : index
    %c0_2 = arith.constant 0 : index
    %1 = vector.load %arg2[%c0_1, %c0_2] : memref<8x1xf32, #tpu.memory_space<vmem>>, vector<8x1xf32>
    %2 = vector.broadcast %1 : vector<8x1xf32> to vector<8x256xf32>
    %3 = arith.mulf %0, %2 : vector<8x256xf32>
    %c0_3 = arith.constant 0 : index
    %c0_4 = arith.constant 0 : index
    %4 = vector.load %arg3[%c0_3, %c0_4] : memref<8x1xf32, #tpu.memory_space<vmem>>, vector<8x1xf32>
    %5 = vector.broadcast %4 : vector<8x1xf32> to vector<8x256xf32>
    %6 = arith.addf %3, %5 : vector<8x256xf32>
    %cst = arith.constant 0.000000e+00 : f32
    %7 = vector.broadcast %cst : f32 to vector<8x256xf32>
    %8 = arith.maximumf %6, %7 : vector<8x256xf32>
    %c0_5 = arith.constant 0 : index
    %c0_6 = arith.constant 0 : index
    %9 = vector.load %arg4[%c0_5, %c0_6] : memref<8x256xf32, #tpu.memory_space<vmem>>, vector<8x256xf32>
    tpu.vector_store %arg4[%c0_5, %c0_6], %8 {strides = array<i32>} : memref<8x256xf32, #tpu.memory_space<vmem>>, vector<8x256xf32>,
    return
  }
  func.func @transform_0(%arg0: i32) -> (i32, i32) {
    %c0_i32 = arith.constant 0 : i32
    %c0_i32_0 = arith.constant 0 : i32
    return %c0_i32, %arg0 : i32, i32
  }
  func.func @transform_1(%arg0: i32) -> (i32, i32) {
    %c0_i32 = arith.constant 0 : i32
    %c0_i32_0 = arith.constant 0 : i32
    %c0_i32_1 = arith.constant 0 : i32
    return %c0_i32, %c0_i32_0 : i32, i32
  }
  func.func @transform_2(%arg0: i32) -> (i32, i32) {
    %c0_i32 = arith.constant 0 : i32
    %c0_i32_0 = arith.constant 0 : i32
    %c0_i32_1 = arith.constant 0 : i32
    return %c0_i32, %c0_i32_0 : i32, i32
  }
  func.func @transform_3(%arg0: i32) -> (i32, i32) {
    %c0_i32 = arith.constant 0 : i32
    %c0_i32_0 = arith.constant 0 : i32
    return %c0_i32, %arg0 : i32, i32
  }
}

</mosaic_0001>

<bundles_post_ra>
// kernel: tile.8
= control target key start
LH: loop header
LB: loop body
LE: loop exit
PB: predicated region body
PF: predicated region fallthrough
CT: control target
= control target key end

     0   :  { %s22_s0 = inlined_call_operand.vmem [shape: f32[128], index: 0, kind: input, shape index: {}]   ;;  %s23_s1 = inlined_call_operand.vmem [shape: f32[2,128], index: 1, kind: output, shape index: {}]  }
   0x1   :  { %v4_v0 = vld [vmem:[%s22_s0] ss:$0 sm:$0xff] }
   0x2   :  { %5 = vst [vmem:[%s23_s1] sm:$0x3] %v4_v0 }

// kernel: depth_conv_layer.3
= control target key start
LH: loop header
LB: loop body
LE: loop exit
PB: predicated region body
PF: predicated region fallthrough
CT: control target
= control target key end

     0   :  { %v42_v0 = vmov 0   ;;  %s81_s1 = inlined_call_operand.vmem [shape: f32[8,1], index: 1, kind: input, shape index: {}]   ;;  %s82_s2 = inlined_call_operand.vmem [shape: f32[8,1], index: 2, kind: input, shape index: {}]   ;;  %s83_s0 = inlined_call_operand.vmem [shape: f32[8,256], index: 0, kind: input, shape index: {}, may-alias: {0,3}]   ;;  %s84_s3 = inlined_call_operand.vmem [shape: f32[8,256], index: 3, kind: output, shape index: {}, may-alias: {0,3}]  }
   0x1   :  { %41 = vset.pattern.permute.xlu0 %v42_v0  ;;  %v16_v1 = vld [vmem:[%s81_s1] sm:$0xff]  ;;  %v15_v5 = vld [vmem:[%s83_s0 + $0x8] sm:$0xff] }
   0x2   :  { %19 = vperm.xlu0 %41, %v16_v1   ;;  %v24_v2 = vld [vmem:[%s82_s2] sm:$0xff] }
   0x3   :  { %v14_v4 = vld [vmem:[%s83_s0] sm:$0xff] }
   0x6   :  { %27 = vperm.xlu0 %41, %v24_v2  }
  0x81   :  { %v20_v3 = vpop.permute.xlu0 %19 }
  0x82   :  { %v22_v6 = vmul.f32 %v20_v3, %v14_v4  ;;  %v23_v7 = vmul.f32 %v20_v3, %v15_v5 }
  0x85   :  { %v28_v8 = vpop.permute.xlu0 %27 }
  0x86   :  { %v30_v9 = vadd.f32 %v28_v8, %v22_v6  ;;  %v31_v10 = vadd.f32 %v28_v8, %v23_v7 }
  0x88   :  { %v32_v11 = vmax.f32 %v30_v9, 0.0  ;;  %v33_v12 = vmax.f32 %v31_v10, 0.0 }
  0x8a   :  { %34 = vst [vmem:[%s84_s3] sm:$0xff] %v32_v11  ;;  %35 = vst [vmem:[%s84_s3 + $0x8] sm:$0xff] %v33_v12 }

// kernel: depth_conv_layer.2
= control target key start
LH: loop header
LB: loop body
LE: loop exit
PB: predicated region body
PF: predicated region fallthrough
CT: control target
= control target key end

     0   :  { %v406_v3 = vmov 0.0   ;;  %v407_v8 = vmov 0   ;;  %s408_s30 = smov 127   ;;  %s409_s12 = smov 122   ;;  %vm43_vm0 = vcmask 261120   ;;  %vm219_vm1 = vcmask 1039360   ;;  %s543_s0 = inlined_call_operand.vmem [shape: f32[32,256], index: 0, kind: input, shape index: {}]   ;;  %s544_s2 = inlined_call_operand.vmem [shape: f32[8,1], index: 2, kind: input, shape index: {}]   ;;  %s545_s1 = inlined_call_operand.vmem [shape: f32[64,32], index: 1, kind: input, shape index: {}]   ;;  %s546_s3 = inlined_call_operand.vmem [shape: f32[1,256], index: 3, kind: input, shape index: {}]   ;;  %s547_s4 = inlined_call_operand.vmem [shape: f32[8,256], index: 4, kind: output, shape index: {0}]   ;;  %s548_s5 = inlined_call_operand.vmem [shape: f32[1,8,2], index: 5, kind: output, shape index: {1}]  }
   0x1   :  { %v36_v0 = vld [vmem:[%s543_s0 + $0x8] sm:$0xff]  ;;  %v38_v1 = vld [vmem:[%s543_s0 + $0x18] sm:$0xff]  ;;  %v35_v2 = vld [vmem:[%s543_s0] sm:$0xff]  ;;  %132 = vmatprep.mubr.f32.mxu0 %v406_v3  ;;  %156 = vmatprep.mubr.f32.mxu1 %v406_v3  ;;  %s410_s16 = smov 123   ;;  %s412_s21 = smov 103   ;;  %vm238_vm2 = vcmask 1006592   ;;  %v344_v60 = vlaneseq }
   0x2   :  { %v384_v4 = vpack.c.bf16 %v38_v1, %v36_v0  ;;  %v37_v5 = vld [vmem:[%s543_s0 + $0x10] sm:$0xff]  ;;  %v40_v6 = vld [vmem:[%s543_s0 + $0x28] sm:$0xff]  ;;  %v42_v7 = vld [vmem:[%s543_s0 + $0x38] sm:$0xff]  ;;  %405 = vset.pattern.permute.xlu0 %v407_v8  ;;  %217 = vrot.lane.b32.xlu1 %v406_v3, %s408_s30  ;;  %s414_s6 = smov 97   ;;  %vm257_vm3 = vcmask 998400   ;;  %vm276_vm4 = vcmask 842752  }
   0x3   :  { %v386_v9 = vpack.c.bf16 %v37_v5, %v35_v2  ;;  %v388_v10 = vpack.c.bf16 %v42_v7, %v40_v6  ;;  %v39_v11 = vld [vmem:[%s543_s0 + $0x20] sm:$0xff]  ;;  %v41_v12 = vld [vmem:[%s543_s0 + $0x30] sm:$0xff]  ;;  %v28_v17 = vld [vmem:[%s545_s1 + $0x8] sm:$0xff]  ;;  %v345_v5 = vshrl.u32 %v344_v60, 7  ;;  %vm295_vm5 = vcmask 834560  }
   0x4   :  { %385 = vmatprep.subr.bf16.mxu0 %v384_v4  ;;  %392 = vmatprep.subr.bf16.mxu1 %v384_v4  ;;  %v390_v13 = vpack.c.bf16 %v41_v12, %v39_v11  ;;  %v197_v14 = vld [vmem:[%s544_s2] sm:$0xff]  ;;  %s411_s2 = smov 102   ;;  %v32_v18 = vld [vmem:[%s545_s1 + $0x28] sm:$0xff]  ;;  %v29_v19 = vld [vmem:[%s545_s1 + $0x10] sm:$0xff]  ;;  %vm314_vm6 = vcmask 801792   ;;  %vm333_vm7 = vcmask 793600  }
   0x5   :  { %387 = vmatpush1.bf16.msra.mxu0 %v386_v9  ;;  %394 = vmatpush1.bf16.msra.mxu1 %v386_v9  ;;  %v27_v15 = vld [vmem:[%s545_s1] sm:$0xff]  ;;  %v33_v20 = vld [vmem:[%s545_s1 + $0x30] sm:$0xff]  ;;  %v30_v21 = vld [vmem:[%s545_s1 + $0x18] sm:$0xff]  ;;  %vm364_vm8 = vcmask 7168   ;;  %vm366_vm9 = vcmask 15360  }
   0x6   :  { %389 = vmatprep.subr.bf16.mxu0 %v388_v10  ;;  %393 = vmatprep.subr.bf16.mxu1 %v388_v10  ;;  %v31_v16 = vld [vmem:[%s545_s1 + $0x20] sm:$0xff]  ;;  %v34_v22 = vld [vmem:[%s545_s1 + $0x38] sm:$0xff]  ;;  %s413_s1 = smov 98  }
   0x7   :  { %202 = vperm.xlu0 %405, %v197_v14   ;;  %255 = vrot.lane.b32.xlu1 %v406_v3, %s409_s12 }
   0x9   :  { %391 = vmatpush1.bf16.msra.mxu0 %v390_v13  ;;  %395 = vmatpush1.bf16.msra.mxu1 %v390_v13 }
   0xb   :  { %236 = vrot.lane.b32.xlu0 %v406_v3, %s410_s16  ;;  %293 = vrot.lane.b32.xlu1 %v406_v3, %s411_s2 }
   0xc   :  { %376 = vmatmul.mubr.msk.f32.vlgmr.msra.gmra.mrb[0].mxu0 %vm43_vm0, %v27_v15  ;;  %380 = vmatmul.mubr.msk.f32.vlgmr.msra.gmra.mrb[0].mxu1 %vm43_vm0, %v31_v16  ;;  %v346_v16 = vsub.s32 0, %v345_v5 }
   0xd   :  { %138 = vmatprep.mubr.f32.mxu0 %v406_v3  ;;  %162 = vmatprep.mubr.f32.mxu1 %v406_v3 }
   0xf   :  { %274 = vrot.lane.b32.xlu0 %v406_v3, %s412_s21 }
  0x10   :  { %377 = vmatmul.mubr.msk.f32.gmra.mrb[2].mxu0 %vm43_vm0, %v28_v17  ;;  %381 = vmatmul.mubr.msk.f32.gmra.mrb[2].mxu1 %vm43_vm0, %v32_v18  ;;  %v350_v17 = vsub.s32 1, %v345_v5 }
  0x11   :  { %144 = vmatprep.mubr.f32.mxu0 %v406_v3  ;;  %168 = vmatprep.mubr.f32.mxu1 %v406_v3 }
  0x14   :  { %378 = vmatmul.mubr.msk.f32.gmra.mrb[4].mxu0 %vm43_vm0, %v29_v19  ;;  %382 = vmatmul.mubr.msk.f32.gmra.mrb[4].mxu1 %vm43_vm0, %v33_v20  ;;  %v342_v20 = vld [vmem:[%s546_s3] sm:$0x3] }
  0x15   :  { %150 = vmatprep.mubr.f32.mxu0 %v406_v3  ;;  %174 = vmatprep.mubr.f32.mxu1 %v406_v3 }
  0x18   :  { %379 = vmatmul.mubr.msk.f32.gmra.mrb[6].mxu0 %vm43_vm0, %v30_v21  ;;  %383 = vmatmul.mubr.msk.f32.gmra.mrb[6].mxu1 %vm43_vm0, %v34_v22 }
  0x74   :  { %v218_v39 = vpop.permute.xlu1 %217 }
  0x79   :  { %v256_v42 = vpop.permute.xlu1 %255 }
  0x7d   :  { %v294_v44 = vpop.permute.xlu1 %293 }
  0x86   :  { %v203_v40 = vpop.permute.xlu0 %202 }
  0x8a   :  { %v237_v41 = vpop.permute.xlu0 %236 }
  0x8e   :  { %v275_v43 = vpop.permute.xlu0 %274 }
  0xdf   :  { %v134_v23 = vpop.f32.mrb[0].mxu0  ;;  %v158_v24 = vpop.f32.mrb[0].mxu1 }
  0xe0   :  { %270 = vrot.lane.b32.xlu0 %v158_v24, %s412_s21  ;;  %v136_v25 = vpop.f32.mrb[1].mxu0  ;;  %v160_v26 = vpop.f32.mrb[1].mxu1  ;;  %v205_v57 = vadd.f32 %v203_v40, %v134_v23 }
  0xe1   :  { %272 = vrot.lane.b32.xlu1 %v160_v26, %s412_s21  ;;  %v206_v54 = vadd.f32 %v203_v40, %v136_v25 }
  0xe3   :  { %v140_v27 = vpop.f32.mrb[2].mxu0  ;;  %v164_v28 = vpop.f32.mrb[2].mxu1 }
  0xe4   :  { %v166_v29 = vpop.f32.mrb[3].mxu1  ;;  %213 = vrot.lane.b32.xlu0 %v140_v27, %s408_s30  ;;  %v142_v30 = vpop.f32.mrb[3].mxu0 }
  0xe5   :  { %289 = vrot.lane.b32.xlu1 %v164_v28, %s411_s2 }
  0xe7   :  { %v146_v31 = vpop.f32.mrb[4].mxu0  ;;  %v170_v32 = vpop.f32.mrb[4].mxu1 }
  0xe8   :  { %291 = vrot.lane.b32.xlu0 %v166_v29, %s411_s2  ;;  %v148_v33 = vpop.f32.mrb[5].mxu0  ;;  %v172_v34 = vpop.f32.mrb[5].mxu1  ;;  %v347_v29 = vrot.slane %v342_v20, %v346_v16 }
  0xe9   :  { %215 = vrot.lane.b32.xlu1 %v142_v30, %s408_s30  ;;  %v351_v30 = vrot.slane %v342_v20, %v350_v17 }
  0xeb   :  { %v152_v35 = vpop.f32.mrb[6].mxu0  ;;  %v176_v36 = vpop.f32.mrb[6].mxu1 }
  0xec   :  { %232 = vrot.lane.b32.xlu0 %v146_v31, %s410_s16  ;;  %v154_v37 = vpop.f32.mrb[7].mxu0  ;;  %v178_v38 = vpop.f32.mrb[7].mxu1 }
  0xed   :  { %234 = vrot.lane.b32.xlu1 %v148_v33, %s410_s16 }
  0xf0   :  { %308 = vrot.lane.b32.xlu0 %v170_v32, %s413_s1 }
  0xf1   :  { %310 = vrot.lane.b32.xlu1 %v172_v34, %s413_s1 }
  0xf4   :  { %253 = vrot.lane.b32.xlu0 %v154_v37, %s409_s12 }
  0xf5   :  { %251 = vrot.lane.b32.xlu1 %v152_v35, %s409_s12 }
  0xf8   :  { %312 = vrot.lane.b32.xlu0 %v406_v3, %s413_s1 }
  0xf9   :  { %327 = vrot.lane.b32.xlu1 %v176_v36, %s414_s6 }
  0xfc   :  { %329 = vrot.lane.b32.xlu0 %v178_v38, %s414_s6 }
  0xfd   :  { %331 = vrot.lane.b32.xlu1 %v406_v3, %s414_s6 }
 0x152   :  { %v271_v45 = vpop.permute.xlu0 %270 }
 0x153   :  { %v273_v46 = vpop.permute.xlu1 %272 }
 0x154   :  { %v278_v8 = vsel %vm276_vm4, %v273_v46, %v275_v43  ;;  %v277_v10 = vsel %vm276_vm4, %v271_v45, %v273_v46 }
 0x156   :  { %v214_v47 = vpop.permute.xlu0 %213 }
 0x157   :  { %v290_v48 = vpop.permute.xlu1 %289 }
 0x15a   :  { %v292_v49 = vpop.permute.xlu0 %291 }
 0x15b   :  { %v216_v50 = vpop.permute.xlu1 %215  ;;  %v297_v13 = vsel %vm295_vm5, %v292_v49, %v294_v44  ;;  %v296_v18 = vsel %vm295_vm5, %v290_v48, %v292_v49 }
 0x15c   :  { %v221_v53 = vsel %vm219_vm1, %v216_v50, %v218_v39  ;;  %v220_v55 = vsel %vm219_vm1, %v214_v47, %v216_v50 }
 0x15d   :  { %v225_v61 = vadd.f32 %v221_v53, %v206_v54  ;;  %v224_v63 = vadd.f32 %v220_v55, %v205_v57 }
 0x15e   :  { %v233_v51 = vpop.permute.xlu0 %232 }
 0x15f   :  { %v235_v52 = vpop.permute.xlu1 %234 }
 0x160   :  { %v240_v58 = vsel %vm238_vm2, %v235_v52, %v237_v41  ;;  %v239_v62 = vsel %vm238_vm2, %v233_v51, %v235_v52 }
 0x161   :  { %v244_v0 = vadd.f32 %v240_v58, %v225_v61  ;;  %v243_v2 = vadd.f32 %v239_v62, %v224_v63 }
 0x162   :  { %v309_v56 = vpop.permute.xlu0 %308 }
 0x163   :  { %v311_v59 = vpop.permute.xlu1 %310 }
 0x164   :  { %v315_v23 = vsel %vm314_vm6, %v309_v56, %v311_v59 }
 0x166   :  { %v254_v1 = vpop.permute.xlu0 %253 }
 0x167   :  { %v259_v3 = vsel %vm257_vm3, %v254_v1, %v256_v42  ;;  %v252_v4 = vpop.permute.xlu1 %251 }
 0x168   :  { %v263_v6 = vadd.f32 %v259_v3, %v244_v0  ;;  %v258_v7 = vsel %vm257_vm3, %v252_v4, %v254_v1 }
 0x169   :  { %v262_v9 = vadd.f32 %v258_v7, %v243_v2 }
 0x16a   :  { %v282_v11 = vadd.f32 %v278_v8, %v263_v6  ;;  %v313_v12 = vpop.permute.xlu0 %312 }
 0x16b   :  { %v281_v14 = vadd.f32 %v277_v10, %v262_v9  ;;  %v328_v15 = vpop.permute.xlu1 %327  ;;  %v316_v21 = vsel %vm314_vm6, %v311_v59, %v313_v12 }
 0x16c   :  { %v301_v19 = vadd.f32 %v297_v13, %v282_v11 }
 0x16d   :  { %v300_v22 = vadd.f32 %v296_v18, %v281_v14 }
 0x16e   :  { %v320_v24 = vadd.f32 %v316_v21, %v301_v19  ;;  %v330_v25 = vpop.permute.xlu0 %329 }
 0x16f   :  { %v319_v26 = vadd.f32 %v315_v23, %v300_v22  ;;  %v334_v27 = vsel %vm333_vm7, %v328_v15, %v330_v25  ;;  %v332_v28 = vpop.permute.xlu1 %331 }
 0x170   :  { %v335_v31 = vsel %vm333_vm7, %v330_v25, %v332_v28 }
 0x171   :  { %v338_v32 = vadd.f32 %v334_v27, %v319_v26  ;;  %v339_v33 = vadd.f32 %v335_v31, %v320_v24 }
 0x173   :  { %340 = vst [vmem:[%s547_s4] sm:$0xff] %v338_v32  ;;  %341 = vst [vmem:[%s547_s4 + $0x8] sm:$0xff] %v339_v33  ;;  %v354_v34 = vmul.f32 %v347_v29, %v338_v32  ;;  %v355_v35 = vmul.f32 %v351_v30, %v339_v33 }
 0x175   :  { %v356_v36 = vadd.f32 %v355_v35, %v354_v34  ;;  %v359_v37 = vmul.f32 %v354_v34, %v338_v32  ;;  %v360_v38 = vmul.f32 %v355_v35, %v339_v33 }
 0x177   :  { %357 = vadd.xlane.f32.xlu0 %v356_v36  ;;  %v361_v39 = vadd.f32 %v360_v38, %v359_v37 }
 0x179   :  { %362 = vadd.xlane.f32.xlu1 %v361_v39 }
 0x204   :  { %v358_v40 = vpop.xlane.xlu0 %357 }
 0x206   :  { %v363_v41 = vpop.xlane.xlu1 %362 }
 0x207   :  { %v365_v42 = vsel %vm364_vm8, %v358_v40, %v363_v41 }
 0x208   :  { %367 = vst.msk [vmem:[%s548_s5] sm:$0xff] %vm366_vm9, %v365_v42 }

</bundles_post_ra>
